<compile_context>
chip_gen: v7x
topology: tpu7x:2x2x1
jax: 0.10.0
libtpu: 0.0.40
codegen_flags: <defaults>
</compile_context>

<pallas_src>
import functools
import math

import jax
import jax.numpy as jnp
from jax import lax
from jax.experimental import pallas as pl
from jax.experimental.pallas import tpu as pltpu

NUM_CLASSES = 31


def _round_up(x, m):
    return (x + m - 1) // m * m


# ----------------------------------------------------------------------------
# Pallas kernel: tiled MXU matmul (bf16 operands, f32 accumulation)
# ----------------------------------------------------------------------------
def _matmul_kernel(a_ref, b_ref, o_ref, acc_ref):
    @pl.when(pl.program_id(2) == 0)
    def _():
        acc_ref[...] = jnp.zeros_like(acc_ref)

    acc_ref[...] += jnp.dot(a_ref[...], b_ref[...],
                            preferred_element_type=jnp.float32)

    @pl.when(pl.program_id(2) == pl.num_programs(2) - 1)
    def _():
        o_ref[...] = acc_ref[...]


@functools.lru_cache(maxsize=None)
def _matmul_callable(Mp, Kp, Np, tm, tk, tn):
    grid = (Mp // tm, Np // tn, Kp // tk)
    flops = 2 * Mp * Np * Kp
    bytes_accessed = 2 * Mp * Kp + 2 * Kp * Np + 4 * Mp * Np   # bf16 in, f32 out
    return pl.pallas_call(
        _matmul_kernel,
        out_shape=jax.ShapeDtypeStruct((Mp, Np), jnp.float32),
        grid_spec=pltpu.PrefetchScalarGridSpec(
            num_scalar_prefetch=0,
            grid=grid,
            in_specs=[pl.BlockSpec((tm, tk), lambda i, j, k: (i, k)),
                      pl.BlockSpec((tk, tn), lambda i, j, k: (k, j))],
            out_specs=pl.BlockSpec((tm, tn), lambda i, j, k: (i, j)),
            scratch_shapes=[pltpu.VMEM((tm, tn), jnp.float32)]),
        compiler_params=pltpu.CompilerParams(
            dimension_semantics=("parallel", "parallel", "arbitrary")),
        cost_estimate=pl.CostEstimate(flops=flops, transcendentals=0,
                                      bytes_accessed=bytes_accessed),
    )


def pallas_matmul(a, b):
    """(M, K) @ (K, N) -> (M, N) f32.  bf16 operands, f32 MXU accumulation.

    Dims are padded up to lane/sublane-aligned tiles (tm<=256, tn<=256,
    tk<=512) so every block satisfies the (16,128) bf16 tiling and the K grid
    axis is exact; tile footprint stays ~2 MiB, safe on v5e/v6e/v7x VMEM.
    """
    M, K = a.shape
    K2, N = b.shape
    assert K == K2
    tm = min(256, _round_up(M, 16))
    tk = min(512, _round_up(K, 128))
    tn = min(256, _round_up(N, 128))
    Mp, Kp, Np = _round_up(M, tm), _round_up(K, tk), _round_up(N, tn)
    a = a.astype(jnp.bfloat16)
    b = b.astype(jnp.bfloat16)
    if (Mp, Kp) != (M, K):
        a = jnp.pad(a, ((0, Mp - M), (0, Kp - K)))
    if (Kp, Np) != (K, N):
        b = jnp.pad(b, ((0, Kp - K), (0, Np - N)))
    out = _matmul_callable(Mp, Kp, Np, tm, tk, tn)(a, b)
    if (Mp, Np) != (M, N):
        out = out[:M, :N]
    return out


# ----------------------------------------------------------------------------
# Pallas kernel: fused DSAN head (bottleneck + classifier + masked softmax)
# ----------------------------------------------------------------------------
def _head_kernel(feat_ref, bw_ref, bb_ref, cw_ref, cb_ref,
                 bottle_ref, logit_ref, prob_ref, *, num_classes):
    feat = feat_ref[...]                                       # (2B, 2048) f32
    # bottleneck Linear(2048 -> 256), single dot for source+target together
    bottle = jnp.dot(feat.astype(jnp.bfloat16), bw_ref[...],
                     preferred_element_type=jnp.float32) + bb_ref[...]
    # classifier Linear(256 -> Cpad) (lane-dense, zero-padded classes)
    logits = jnp.dot(bottle.astype(jnp.bfloat16), cw_ref[...],
                     preferred_element_type=jnp.float32) + cb_ref[...]
    # softmax over the real classes only (padded columns masked out)
    col = lax.broadcasted_iota(jnp.int32, logits.shape, 1)
    valid = col < num_classes
    masked = jnp.where(valid, logits, -jnp.inf)
    m = jnp.max(masked, axis=-1, keepdims=True)
    e = jnp.where(valid, jnp.exp(logits - m), 0.0)
    denom = jnp.sum(e, axis=-1, keepdims=True)
    bottle_ref[...] = bottle
    logit_ref[...] = logits
    prob_ref[...] = e * pl.reciprocal(denom, approx=True)


def dsan_head(feat_s, feat_t, bottle_w, bottle_b, cls_w, cls_b):
    """Returns (total_bottle (2B,256), s_pred (B,C), t_prob (B,C))."""
    B = feat_s.shape[0]
    D = bottle_w.shape[1]
    C = cls_w.shape[1]
    Cpad = _round_up(C, 128)
    cls_w_p = jnp.pad(cls_w, ((0, 0), (0, Cpad - C))).astype(jnp.bfloat16)
    cls_b_p = jnp.pad(cls_b, (0, Cpad - C)).reshape(1, Cpad)
    feat = jnp.concatenate([feat_s, feat_t], axis=0)           # (2B, 2048)

    bottle, logits, probs = pl.pallas_call(
        functools.partial(_head_kernel, num_classes=C),
        out_shape=(jax.ShapeDtypeStruct((2 * B, D), jnp.float32),
                   jax.ShapeDtypeStruct((2 * B, Cpad), jnp.float32),
                   jax.ShapeDtypeStruct((2 * B, Cpad), jnp.float32)),
        in_specs=[pl.BlockSpec(memory_space=pltpu.MemorySpace.VMEM)] * 5,
        out_specs=tuple(pl.BlockSpec(memory_space=pltpu.MemorySpace.VMEM)
                        for _ in range(3)),
    )(feat, bottle_w.astype(jnp.bfloat16), bottle_b.reshape(1, D),
      cls_w_p, cls_b_p)

    s_pred = logits[:B, :C]
    t_prob = probs[B:, :C]
    return bottle, s_pred, t_prob


# ----------------------------------------------------------------------------
# Pallas kernel: LMMD multi-bandwidth gaussian-kernel loss (Gram-matrix form)
# ----------------------------------------------------------------------------
def _lmmd_kernel(total_ref, w_ref, loss_ref):
    kernel_mul, kernel_num = 2.0, 5
    total = total_ref[...]                                     # (n, D) f32
    n = total.shape[0]
    # Gram matrix via one MXU matmul (NT contraction, no explicit transpose)
    gram = jnp.einsum('id,jd->ij', total, total,
                      preferred_element_type=jnp.float32)      # (n, n)
    rid = lax.broadcasted_iota(jnp.int32, (n, n), 0)
    cid = lax.broadcasted_iota(jnp.int32, (n, n), 1)
    eye = (rid == cid).astype(jnp.float32)
    sq_col = jnp.sum(gram * eye, axis=1, keepdims=True)        # (n, 1) = diag
    sq_row = jnp.sum(gram * eye, axis=0, keepdims=True)        # (1, n) = diag
    l2 = jnp.maximum(sq_col + sq_row - 2.0 * gram, 0.0)        # pairwise |x-y|^2
    bandwidth = jnp.sum(l2) * (1.0 / float(n * n - n))
    bandwidth = bandwidth * (1.0 / (kernel_mul ** (kernel_num // 2)))
    inv_bw = 1.0 / bandwidth                                   # one scalar divide
    kernels = jnp.zeros_like(l2)
    for i in range(kernel_num):
        kernels = kernels + jnp.exp(-l2 * (inv_bw * (kernel_mul ** -i)))
    loss = jnp.sum(w_ref[...] * kernels)
    has_nan = jnp.any(jnp.isnan(kernels))
    loss_ref[...] = jnp.zeros((1, 1), jnp.float32) + jnp.where(
        has_nan, jnp.float32(0.0), loss)


def lmmd_kernel_loss(total, weight_full):
    out = pl.pallas_call(
        _lmmd_kernel,
        out_shape=jax.ShapeDtypeStruct((1, 1), jnp.float32),
        in_specs=[pl.BlockSpec(memory_space=pltpu.MemorySpace.VMEM)] * 2,
        out_specs=pl.BlockSpec(memory_space=pltpu.MemorySpace.VMEM),
    )(total, weight_full)
    return out.reshape(1)   # torch returns a shape-(1,) tensor


# ----------------------------------------------------------------------------
# JAX glue: conv (1x1 via Pallas matmul, spatial via XLA), batchnorm, maxpool
# ----------------------------------------------------------------------------
def conv2d(x, w, stride, pad):
    """x: NHWC f32; w: PyTorch-layout (Cout, Cin, kh, kw); no bias."""
    Cout, Cin, kh, kw = w.shape
    if kh == 1 and kw == 1 and pad == 0:
        xs = x[:, ::stride, ::stride, :] if stride > 1 else x
        B, H, W, _ = xs.shape
        out = pallas_matmul(xs.reshape(B * H * W, Cin),
                            jnp.transpose(w.reshape(Cout, Cin), (1, 0)))
        return out.reshape(B, H, W, Cout)
    # TODO(synk): 3x3/7x7 convs use XLA's native conv (no HBM im2col blowup);
    # folding the kh*kw patch loop into the Pallas matmul K axis is a follow-up.
    return lax.conv_general_dilated(
        x.astype(jnp.bfloat16),
        jnp.transpose(w, (2, 3, 1, 0)).astype(jnp.bfloat16),   # HWIO
        window_strides=(stride, stride),
        padding=((pad, pad), (pad, pad)),
        dimension_numbers=('NHWC', 'HWIO', 'NHWC'),
        preferred_element_type=jnp.float32)


def batchnorm(x, gamma, beta, eps=1e-5):
    # training-mode BN (batch statistics), f32 stats, matching a fresh nn.Module
    mean = jnp.mean(x, axis=(0, 1, 2), keepdims=True)
    var = jnp.mean((x - mean) ** 2, axis=(0, 1, 2), keepdims=True)
    return (x - mean) / jnp.sqrt(var + eps) * gamma + beta


def maxpool_3x3_s2_p1(x):
    return lax.reduce_window(x, -jnp.inf, lax.max,
                             (1, 3, 3, 1), (1, 2, 2, 1),
                             padding=((0, 0), (1, 1), (1, 1), (0, 0)))


# ----------------------------------------------------------------------------
# ResNet-50 (Bottleneck blocks, layers [3, 4, 6, 3])
# ----------------------------------------------------------------------------
class _KeyGen:
    def __init__(self, key):
        self.key = key
        self.i = 0

    def __call__(self):
        k = jax.random.fold_in(self.key, self.i)
        self.i += 1
        return k


def _conv_init(kg, cout, cin, kh, kw):
    n = kh * kw * cout
    std = math.sqrt(2.0 / n)
    return std * jax.random.normal(kg(), (cout, cin, kh, kw), jnp.float32)


def _bn_init(c):
    return (jnp.ones((c,), jnp.float32), jnp.zeros((c,), jnp.float32))


def init_resnet50(kg):
    params = {'conv1': _conv_init(kg, 64, 3, 7, 7), 'bn1': _bn_init(64)}
    inplanes = 64
    cfg = [(64, 3, 1), (128, 4, 2), (256, 6, 2), (512, 3, 2)]
    for li, (planes, blocks, stride) in enumerate(cfg, start=1):
        layer = []
        for b in range(blocks):
            s = stride if b == 0 else 1
            need_ds = (b == 0) and (s != 1 or inplanes != planes * 4)
            blk = {
                'conv1': _conv_init(kg, planes, inplanes, 1, 1),
                'bn1': _bn_init(planes),
                'conv2': _conv_init(kg, planes, planes, 3, 3),
                'bn2': _bn_init(planes),
                'conv3': _conv_init(kg, planes * 4, planes, 1, 1),
                'bn3': _bn_init(planes * 4),
                'stride': s,
            }
            if need_ds:
                blk['ds_conv'] = _conv_init(kg, planes * 4, inplanes, 1, 1)
                blk['ds_bn'] = _bn_init(planes * 4)
            inplanes = planes * 4
            layer.append(blk)
        params[f'layer{li}'] = layer
    return params


def bottleneck_forward(p, x):
    out = conv2d(x, p['conv1'], 1, 0)
    out = jax.nn.relu(batchnorm(out, *p['bn1']))
    out = conv2d(out, p['conv2'], p['stride'], 1)
    out = jax.nn.relu(batchnorm(out, *p['bn2']))
    out = conv2d(out, p['conv3'], 1, 0)
    out = batchnorm(out, *p['bn3'])
    if 'ds_conv' in p:
        residual = batchnorm(conv2d(x, p['ds_conv'], p['stride'], 0), *p['ds_bn'])
    else:
        residual = x
    return jax.nn.relu(out + residual)


def resnet_forward(params, x_nchw):
    x = jnp.transpose(x_nchw, (0, 2, 3, 1)).astype(jnp.float32)   # NCHW -> NHWC
    x = conv2d(x, params['conv1'], 2, 3)
    x = jax.nn.relu(batchnorm(x, *params['bn1']))
    x = maxpool_3x3_s2_p1(x)
    for name in ('layer1', 'layer2', 'layer3', 'layer4'):
        for blk in params[name]:
            x = bottleneck_forward(blk, x)
    # global average pool + flatten (PyTorch AvgPool2d over full spatial + view)
    return jnp.mean(x, axis=(1, 2))                               # (B, 2048)


# ----------------------------------------------------------------------------
# LMMD weight computation (label-side logic; numpy-on-CPU in the original)
# ----------------------------------------------------------------------------
def lmmd_cal_weight(s_label, t_prob, class_num):
    s_vec = jax.nn.one_hot(s_label, class_num, dtype=jnp.float32)
    s_sum = jnp.sum(s_vec, axis=0, keepdims=True)
    s_sum = jnp.where(s_sum == 0, 100.0, s_sum)
    s_vec = s_vec / s_sum

    t_sca = jnp.argmax(t_prob, axis=1)
    t_vec = t_prob
    t_sum = jnp.sum(t_vec, axis=0, keepdims=True)
    t_sum = jnp.where(t_sum == 0, 100.0, t_sum)
    t_vec = t_vec / t_sum

    s_present = jnp.zeros((class_num,), jnp.float32).at[s_label].set(1.0)
    t_present = jnp.zeros((class_num,), jnp.float32).at[t_sca].set(1.0)
    mask = s_present * t_present                      # classes in both batches
    s_vec = s_vec * mask[None, :]
    t_vec = t_vec * mask[None, :]

    w_ss = s_vec @ s_vec.T
    w_tt = t_vec @ t_vec.T
    w_st = s_vec @ t_vec.T
    length = jnp.sum(mask)
    scale = jnp.where(length > 0, 1.0 / jnp.maximum(length, 1.0), 0.0)
    return w_ss * scale, w_tt * scale, w_st * scale


# ----------------------------------------------------------------------------
# DSAN
# ----------------------------------------------------------------------------
def init_dsan_params(key, num_classes=NUM_CLASSES):
    kg = _KeyGen(key)
    params = {'resnet': init_resnet50(kg)}
    params['bottle_w'] = 0.01 * jax.random.normal(kg(), (2048, 256), jnp.float32)
    params['bottle_b'] = jnp.zeros((256,), jnp.float32)
    params['cls_w'] = 0.01 * jax.random.normal(kg(), (256, num_classes), jnp.float32)
    params['cls_b'] = jnp.zeros((num_classes,), jnp.float32)
    return params


def dsan_forward(params, source, target, s_label, num_classes=NUM_CLASSES):
    feat_s = resnet_forward(params['resnet'], source)
    feat_t = resnet_forward(params['resnet'], target)

    total, s_pred, t_prob = dsan_head(
        feat_s, feat_t,
        params['bottle_w'], params['bottle_b'],
        params['cls_w'], params['cls_b'])

    w_ss, w_tt, w_st = lmmd_cal_weight(s_label, t_prob, num_classes)
    # block weight matrix so that sum(W * K) == sum(wss*SS + wtt*TT - 2*wst*ST)
    top = jnp.concatenate([w_ss, -w_st], axis=1)
    bot = jnp.concatenate([-w_st.T, w_tt], axis=1)
    w_full = jnp.concatenate([top, bot], axis=0)

    loss_lmmd = lmmd_kernel_loss(total, w_full)
    return s_pred, loss_lmmd


if __name__ == "__main__":
    key = jax.random.PRNGKey(0)
    k1, k2, k3, kp = jax.random.split(key, 4)
    B = 2
    source = jax.random.normal(k1, (B, 3, 64, 64), jnp.float32)
    target = jax.random.normal(k2, (B, 3, 64, 64), jnp.float32)
    s_label = jax.random.randint(k3, (B,), 0, NUM_CLASSES, jnp.int32)

    params = init_dsan_params(kp, NUM_CLASSES)
    s_pred, loss_lmmd = dsan_forward(params, source, target, s_label)
    jax.block_until_ready((s_pred, loss_lmmd))

    assert s_pred.shape == (B, NUM_CLASSES)
    assert loss_lmmd.shape == (1,)
    assert bool(jnp.all(jnp.isfinite(s_pred))) and bool(jnp.isfinite(loss_lmmd[0]))
    print("KERNEL_OK")
</pallas_src>

<mosaic_0001>
module attributes {stable_mosaic.version = 11 : i64} {
  func.func @_matmul_kernel(%arg0: i32, %arg1: i32, %arg2: i32, %arg3: memref<256x128xbf16, #tpu.memory_space<vmem>>, %arg4: memref<128x128xbf16, #tpu.memory_space<vmem>>, %arg5: memref<256x128xf32, #tpu.memory_space<vmem>>, %arg6: memref<256x128xf32, #tpu.memory_space<vmem>>) attributes {dimension_semantics = [#tpu.dimension_semantics<parallel>, #tpu.dimension_semantics<parallel>, #tpu.dimension_semantics<arbitrary>], iteration_bounds = array<i64: 2, 1, 1>, scalar_prefetch = 0 : i64, scratch_operands = 1 : i64, tpu.core_type = #tpu.core_type<tc>, window_params = [{transform_indices = @transform_0, window_bounds = array<i64: 256, 128>}, {transform_indices = @transform_1, window_bounds = array<i64: 128, 128>}, {transform_indices = @transform_2, window_bounds = array<i64: 256, 128>}]} {
    %c0_i32 = arith.constant 0 : i32
    %0 = arith.cmpi eq, %arg2, %c0_i32 : i32
    %1 = arith.extui %0 : i1 to i32
    %c0_i32_0 = arith.constant 0 : i32
    %2 = arith.cmpi ne, %1, %c0_i32_0 : i32
    scf.if %2 {
      %cst_10 = arith.constant 0.000000e+00 : f32
      %12 = vector.broadcast %cst_10 : f32 to vector<256x128xf32>
      %c0_11 = arith.constant 0 : index
      %c0_12 = arith.constant 0 : index
      %13 = vector.load %arg6[%c0_11, %c0_12] : memref<256x128xf32, #tpu.memory_space<vmem>>, vector<256x128xf32>
      tpu.vector_store %arg6[%c0_11, %c0_12], %12 {strides = array<i32>} : memref<256x128xf32, #tpu.memory_space<vmem>>, vector<256x128xf32>,
    } else {
    }
    %c0 = arith.constant 0 : index
    %c0_1 = arith.constant 0 : index
    %3 = vector.load %arg6[%c0, %c0_1] : memref<256x128xf32, #tpu.memory_space<vmem>>, vector<256x128xf32>
    %c0_2 = arith.constant 0 : index
    %c0_3 = arith.constant 0 : index
    %4 = vector.load %arg3[%c0_2, %c0_3] : memref<256x128xbf16, #tpu.memory_space<vmem>>, vector<256x128xbf16>
    %c0_4 = arith.constant 0 : index
    %c0_5 = arith.constant 0 : index
    %5 = vector.load %arg4[%c0_4, %c0_5] : memref<128x128xbf16, #tpu.memory_space<vmem>>, vector<128x128xbf16>
    %cst = arith.constant dense<0.000000e+00> : vector<256x128xf32>
    %6 = tpu.matmul %4, %5, %cst {dimension_numbers = #tpu.dot_dimension_numbers<[1], [0], [0], [1], [0, 0, 1, 1], [], []>} : vector<256x128xbf16>, vector<128x128xbf16>, vector<256x128xf32> -> vector<256x128xf32>
    %7 = arith.addf %3, %6 : vector<256x128xf32>
    %c0_6 = arith.constant 0 : index
    %c0_7 = arith.constant 0 : index
    %8 = vector.load %arg6[%c0_6, %c0_7] : memref<256x128xf32, #tpu.memory_space<vmem>>, vector<256x128xf32>
    tpu.vector_store %arg6[%c0_6, %c0_7], %7 {strides = array<i32>} : memref<256x128xf32, #tpu.memory_space<vmem>>, vector<256x128xf32>,
    %c0_i32_8 = arith.constant 0 : i32
    %9 = arith.cmpi eq, %arg2, %c0_i32_8 : i32
    %10 = arith.extui %9 : i1 to i32
    %c0_i32_9 = arith.constant 0 : i32
    %11 = arith.cmpi ne, %10, %c0_i32_9 : i32
    scf.if %11 {
      %c0_10 = arith.constant 0 : index
      %c0_11 = arith.constant 0 : index
      %12 = vector.load %arg6[%c0_10, %c0_11] : memref<256x128xf32, #tpu.memory_space<vmem>>, vector<256x128xf32>
      %c0_12 = arith.constant 0 : index
      %c0_13 = arith.constant 0 : index
      %13 = vector.load %arg5[%c0_12, %c0_13] : memref<256x128xf32, #tpu.memory_space<vmem>>, vector<256x128xf32>
      tpu.vector_store %arg5[%c0_12, %c0_13], %12 {strides = array<i32>} : memref<256x128xf32, #tpu.memory_space<vmem>>, vector<256x128xf32>,
    } else {
    }
    return
  }
  func.func @transform_0(%arg0: i32, %arg1: i32, %arg2: i32) -> (i32, i32) {
    %c0_i32 = arith.constant 0 : i32
    return %arg0, %arg2 : i32, i32
  }
  func.func @transform_1(%arg0: i32, %arg1: i32, %arg2: i32) -> (i32, i32) {
    %c0_i32 = arith.constant 0 : i32
    return %arg2, %arg1 : i32, i32
  }
  func.func @transform_2(%arg0: i32, %arg1: i32, %arg2: i32) -> (i32, i32) {
    %c0_i32 = arith.constant 0 : i32
    return %arg0, %arg1 : i32, i32
  }
}

</mosaic_0001>

<bundles_post_ra>
// kernel: tpu_custom_call.1
= control target key start
LH: loop header
LB: loop body
LE: loop exit
PB: predicated region body
PF: predicated region fallthrough
CT: control target
= control target key end

     0   :  { %7 = vsyncpa [#allocation4], 0  ;;  %s1564_s0 = inlined_call_operand.hbm [shape: bf16[512,128], index: 0, kind: input, shape index: {}]   ;;  %s1565_s1 = inlined_call_operand.hbm [shape: bf16[128,128], index: 1, kind: input, shape index: {}]   ;;  %s1566_s2 = inlined_call_operand.hbm [shape: f32[512,128], index: 2, kind: output, shape index: {}]  }
   0x1   :  { %9 = vsyncpa [#allocation4 + $0x1], 0 }
   0x2   :  { %10 = vsyncpa [#allocation7], 0 }
   0x3   :  { %11 = vsyncpa [#allocation5], 0 }
   0x4   :  { %13 = vsyncpa [#allocation5 + $0x1], 0  ;;  %s1285_s9 = smov 0   ;;  %s1287_s10 = smov 0  }
   0x5   :  { %s1289_s11 = smov 0   ;;  %s1291_s12 = smov 0  }
   0x6   :  { %s1293_s13 = smov 0   ;;  %s1295_s14 = smov 0  }
   0x7 LB: > { %s885_s15 = sadd.s32 4294967295, %s1261_s14   ;;  %s886_s16 = sadd.s32 4294967294, %s1261_s14   ;;  %s1261_s14 = sphi %s1295_s14, %s19_s14   ;;  %s1257_s13 = sphi %s1293_s13, %s1590_s13   ;;  %s1253_s12 = sphi %s1291_s12, %s1589_s12   ;;  %s1249_s11 = sphi %s1289_s11, %s1588_s11   ;;  %s1245_s10 = sphi %s1287_s10, %s1587_s10   ;;  %s1241_s9 = sphi %s1285_s9, %s1586_s9  }
   0x8   : > { %p60_p0 = scmp.ne.s32.totalorder %s1245_s10, %s1241_s9  ;;  %p1319_p1 = scmp.eq.s32.totalorder %s885_s15, 0 }
   0x9   : > { %p1323_p2 = scmp.eq.s32.totalorder %s885_s15, 1  ;;  %p120_p3 = scmp.eq.s32.totalorder %s886_s16, 1 }
   0xa   : > { %s1571_s17 = scalar_select %p1319_p1, 1, 0 }
   0xb   : > { %s1572_s18 = scalar_select %p1323_p2, 1, 0 }
   0xc   : > { %p1329_p4 = por %p1319_p1, %p60_p0  ;;  %p887_p5 = scmp.ge.s32.totalorder %s1261_s14, 1 }
   0xd   : > { %p1334_p6 = por %p120_p3, %p60_p0  ;;  %p127_p7 = scmp.lt.s32.totalorder %s1261_s14, 3 }
   0xe   : > { %s1573_s19 = scalar_select %p1329_p4, 1, 0 }
   0xf   : > { %s1574_s20 = scalar_select %p1334_p6, 1, 0 }
  0x10   : > { %p1339_p8 = pnand %p887_p5, %p127_p7  ;;  %s1263_s22 = smov [#allocation6]  }
  0x11   : > { %s143_s23 = sshll.u32 %s1263_s22, 4  ;;  %s38_s25 = sadd.s32 1, %s1257_s13  ;;  %s144_s23 = int_to_ptr.vmem [resolvable:$true] %s143_s23 }
  0x12   : > { %s1575_s21 = scalar_select %p1339_p8, 1, 0 }
  0x13   : > { %p1024_p9 = pneg %p1339_p8  ;;  %s1117_s28 = scalar_lea.hbm %s1565_s1, 1024 }
  0x14   : > { %p1118_p12 = scmp.ne.s32.totalorder %s1565_s1, %s1117_s28  ;;  %p1124_p5 = scmp.lt.u32.totalorder %s1117_s28, %s1565_s1 }
  0x15   : > { %p1348_p11 = pnand %p1024_p9, %p1319_p1 }
  0x17   : > { %p1119_p13 = pneg %p1348_p11 }
  0x19   : > { %p1120_p0 = pnand %p1119_p13, %p1118_p12 }
  0x1b   : > { %p1121_p3 = pneg %p1120_p0 }
  0x1d   : > { %p1126_p7 = pnand %p1124_p5, %p1121_p3 }
  0x1f   : > { %1129 = shalt.err (!%p1126_p7)
}
  0x20   : > { %s1130_s5 = scalar_lea.vmem %s144_s23, 1024  ;;  %p1138_p1 = scmp.lt.s32.totalorder %s144_s23, %s144_s23 }
  0x21   : > { %p1131_p9 = scmp.ne.s32.totalorder %s144_s23, %s1130_s5  ;;  %p1139_p4 = scmp.lt.s32.totalorder %s1130_s5, %s1130_s5 }
  0x23   : > { %p1133_p10 = pnand %p1131_p9, %p1119_p13  ;;  %p1140_p8 = por %p1139_p4, %p1138_p1 }
  0x25   : > { %p1134_p6 = pneg %p1133_p10 }
  0x27   : > { %p1141_p2 = pnand %p1140_p8, %p1134_p6 }
  0x29   : > { %1144 = shalt.err (!%p1141_p2)
}
  0x2a   : > { %s1264_s6 = smov 64   ;;  %s1265_s7 = smov 4  }
  0x2b   : > { %1027 = dma.hbm_to_vmem [thread:$0]  (!%p1348_p11), %s1565_s1, 1024, %s144_s23, [#allocation7], %s1264_s6, %s1264_s6, %s1265_s7  }
  0x2c   : > { %p40_p1 = scmp.ge.s32.totalorder %s38_s25, 2  ;;  %s47_s16 = sadd.s32 1, %s1249_s11 }
  0x2d   : > { %p54_p2 = scmp.ne.s32.totalorder %s1249_s11, %s1245_s10  ;;  %p55_p4 = scmp.eq.s32.totalorder %s1261_s14, 0 }
  0x2e   : > { %s1592_s25 = smov (%p40_p1, %s38_s25), 0  ;;  %p1578_p8 = scmp.ne.s32.totalorder %s1572_s18, 0 }
  0x2f   : > { %p1378_p6 = por %p55_p4, %p54_p2  ;;  %s42_s26 = ssub.s32 %s1257_s13, %s1592_s25 }
  0x30   : > { %p1384_p10 = por %p1578_p8, %p54_p2  ;;  %p1037_p12 = scmp.lt.s32.totalorder %s1261_s14, 2 }
  0x31   : > { %p45_p11 = scmp.eq.s32.totalorder %s42_s26, 0  ;;  %s157_s23 = sand.u32 1, %s1249_s11  }
  0x32   : > { %s890_s27 = sshll.u32 %s157_s23, 7  ;;  %s926_s29 = sshll.u32 %s1257_s13, 11 }
  0x33   : > { %s1393_s28 = scalar_select %p45_p11, %s1249_s11, %s47_s16  }
  0x34   : > { %s1399_s4 = scalar_lea.hbm %s1564_s0, %s926_s29  ;;  %s161_s18 = scalar_lea.vmem [#allocation3], %s890_s27 }
  0x35   : > { %s169_s5 = sshll.u32 %s161_s18, 4  ;;  %p1405_p13 = pnand %p1037_p12, %p1378_p6  ;;  %s1401_s5 = int_to_ptr.vmem [resolvable:$true] %s169_s5 }
  0x36   : > { %s1409_s15 = scalar_lea.sflag [#allocation4], %s157_s23  ;;  %s1145_s16 = scalar_lea.hbm %s1399_s4, 2048 }
  0x37   : > { %p1146_p0 = scmp.ne.s32.totalorder %s1399_s4, %s1145_s16  ;;  %p1147_p3 = pneg %p1405_p13 }
  0x38   : > { %s1150_s22 = scalar_lea.hbm %s1564_s0, 4096  ;;  %p1151_p9 = scmp.lt.u32.totalorder %s1399_s4, %s1564_s0 }
  0x39   : > { %p1148_p5 = pnand %p1147_p3, %p1146_p0  ;;  %p1152_p1 = scmp.lt.u32.totalorder %s1150_s22, %s1145_s16 }
  0x3a   : > { %p1154_p4 = scmp.lt.u32.totalorder %s1145_s16, %s1399_s4 }
  0x3b   : > { %p1149_p7 = pneg %p1148_p5  ;;  %p1153_p2 = por %p1152_p1, %p1151_p9 }
  0x3d   : > { %p1155_p6 = por %p1154_p4, %p1153_p2 }
  0x3f   : > { %p1156_p8 = pnand %p1155_p6, %p1149_p7 }
  0x41   : > { %1159 = shalt.err (!%p1156_p8)
}
  0x42   : > { %s1160_s23 = scalar_lea.vmem %s1401_s5, 2048  ;;  %s1266_s3 = smov [#allocation3]  }
  0x43   : > { %p1161_p12 = scmp.ne.s32.totalorder %s1401_s5, %s1160_s23  ;;  %s1165_s18 = sshll.u32 %s1266_s3, 4  ;;  %s1166_s18 = int_to_ptr.vmem [resolvable:$false] %s1165_s18 }
  0x44   : > { %s1167_s26 = scalar_lea.vmem %s1166_s18, 4096  ;;  %p1168_p5 = scmp.lt.s32.totalorder %s1401_s5, %s1166_s18 }
  0x45   : > { %p1163_p11 = pnand %p1161_p12, %p1147_p3  ;;  %p1169_p9 = scmp.lt.s32.totalorder %s1167_s26, %s1160_s23 }
  0x47   : > { %p1164_p0 = pneg %p1163_p11  ;;  %p1170_p1 = por %p1169_p9, %p1168_p5 }
  0x49   : > { %p1171_p2 = pnand %p1170_p1, %p1164_p0 }
  0x4b   : > { %1174 = shalt.err (!%p1171_p2)
}
  0x4c   : > { %1031 = dma.hbm_to_vmem [thread:$0]  (!%p1405_p13), %s1399_s4, 2048, %s1401_s5, %s1409_s15, %s1264_s6, %s1264_s6, %s1265_s7  }
  0x4d   : > { %p1581_p3 = scmp.ne.s32.totalorder %s1575_s21, 0 }
  0x4e   : > { %s1443_s16 = sand.u32 (!%p1581_p3), 1, %s1245_s10   ;;  %p1582_p7 = scmp.ne.s32.totalorder (!%p1581_p3), %s1573_s19, 0 }
  0x4f   : > { %181 = sbr.rel (%p1581_p3) target bundleno = 377 (0x179), region = 28  ;;  %s894_s27 = sshll.u32 (!%p1581_p3), %s1443_s16, 7 }
  0x50   : > { %s184_s22 = scalar_lea.sflag (!%p1581_p3), [#allocation4], %s1443_s16  ;;  %s1447_s29 = scalar_lea.vmem (!%p1581_p3), [#allocation3], %s894_s27 }
  0x56   : > { %1228 = dma.done.wait (%p1582_p7), %s184_s22, 2048  }
  0x57   : > { %1230 = vsyncadd (%p1582_p7), %s184_s22, 4294965248  ;;  %p1583_p13 = scmp.ne.s32.totalorder %s1571_s17, 0 }
  0x59   : > { %1232 = dma.done.wait (%p1583_p13), [#allocation7], 1024  }
  0x5a   : > { %1234 = vsyncadd (%p1583_p13), [#allocation7], 4294966272  ;;  %v1093_v0 = vld [vmem:[#allocation6] sm:$0xff]   ;;  %v1094_v1 = vld [vmem:[#allocation6 + $0x8] sm:$0xff]   ;;  %s896_s17 = sshll.u32 %s1443_s16, 8  ;;  %s927_s21 = sshll.u32 %s1253_s12, 12 }
  0x5b   : > { %952 = vmatprep.subr.bf16.mxu0 %v1093_v0  ;;  %1000 = vmatprep.subr.bf16.mxu1 %v1093_v0  ;;  %v1095_v2 = vld [vmem:[#allocation6 + $0x10] sm:$0xff]   ;;  %v1096_v3 = vld [vmem:[#allocation6 + $0x18] sm:$0xff]   ;;  %v1101_v4 = vld [vmem:[%s1447_s29] sm:$0xff]   ;;  %s1474_s19 = scalar_lea.vmem [#allocation8], %s896_s17  ;;  %s1507_s5 = scalar_lea.hbm %s1566_s2, %s927_s21 }
  0x5c   : > { %953 = vmatpush3.bf16.msra.mxu0 %v1093_v0  ;;  %1008 = vmatpush3.bf16.msra.mxu1 %v1093_v0  ;;  %v1102_v5 = vld [vmem:[%s1447_s29 + $0x40] sm:$0xff]   ;;  %v1098_v7 = vld [vmem:[#allocation6 + $0x28] sm:$0xff]   ;;  %v1099_v8 = vld [vmem:[#allocation6 + $0x30] sm:$0xff]   ;;  %s783_s6 = sshll.u32 %s1474_s19, 4  ;;  %s769_s12 = scalar_lea.sflag [#allocation5], %s1443_s16  ;;  %s1509_s6 = int_to_ptr.vmem [resolvable:$true] %s783_s6 }
  0x5d   : > { %954 = vmatprep.subr.bf16.mxu0 %v1094_v1  ;;  %1001 = vmatprep.subr.bf16.mxu1 %v1094_v1  ;;  %v1097_v6 = vld [vmem:[#allocation6 + $0x20] sm:$0xff]   ;;  %v1100_v9 = vld [vmem:[#allocation6 + $0x38] sm:$0xff]   ;;  %v1103_v10 = vld [vmem:[%s1447_s29 + $0x8] sm:$0xff]   ;;  %s1175_s8 = scalar_lea.vmem %s1509_s6, 4096  ;;  %s1267_s15 = smov [#allocation8]  }
  0x5e   : > { %968 = vmatprep.mubr.bf16.mxu0 %v1101_v4  ;;  %984 = vmatprep.mubr.bf16.mxu1 %v1102_v5  ;;  %v1104_v11 = vld [vmem:[%s1447_s29 + $0x48] sm:$0xff]   ;;  %v1105_v12 = vld [vmem:[%s1447_s29 + $0x10] sm:$0xff]   ;;  %v1107_v14 = vld [vmem:[%s1447_s29 + $0x18] sm:$0xff]   ;;  %p1176_p4 = scmp.ne.s32.totalorder %s1509_s6, %s1175_s8  ;;  %s1179_s30 = sshll.u32 %s1267_s15, 4  ;;  %s1180_s30 = int_to_ptr.vmem [resolvable:$false] %s1179_s30 }
  0x5f   : > { %v1106_v13 = vld [vmem:[%s1447_s29 + $0x50] sm:$0xff]   ;;  %v1108_v15 = vld [vmem:[%s1447_s29 + $0x58] sm:$0xff]   ;;  %v1109_v16 = vld [vmem:[%s1447_s29 + $0x20] sm:$0xff]   ;;  %s1181_s23 = scalar_lea.vmem %s1180_s30, 8192  ;;  %p1182_p12 = scmp.lt.s32.totalorder %s1509_s6, %s1180_s30 }
  0x60   : > { %955 = vmatpush3.bf16.msra.mxu0 %v1094_v1  ;;  %1009 = vmatpush3.bf16.msra.mxu1 %v1094_v1  ;;  %v1110_v17 = vld [vmem:[%s1447_s29 + $0x60] sm:$0xff]   ;;  %v1111_v18 = vld [vmem:[%s1447_s29 + $0x28] sm:$0xff]   ;;  %v1113_v20 = vld [vmem:[%s1447_s29 + $0x30] sm:$0xff]   ;;  %p1177_p6 = pnand %p1176_p4, %p1384_p10  ;;  %p1183_p11 = scmp.lt.s32.totalorder %s1181_s23, %s1175_s8 }
  0x61   : > { %956 = vmatprep.subr.bf16.mxu0 %v1095_v2  ;;  %1002 = vmatprep.subr.bf16.mxu1 %v1095_v2  ;;  %v1112_v19 = vld [vmem:[%s1447_s29 + $0x68] sm:$0xff]   ;;  %v1114_v21 = vld [vmem:[%s1447_s29 + $0x70] sm:$0xff]   ;;  %v1115_v22 = vld [vmem:[%s1447_s29 + $0x38] sm:$0xff]  }
  0x62   : > { %v1116_v23 = vld [vmem:[%s1447_s29 + $0x78] sm:$0xff]   ;;  %p1178_p8 = pneg %p1177_p6  ;;  %p1184_p0 = por %p1183_p11, %p1182_p12 }
  0x64   : > { %957 = vmatpush3.bf16.msra.mxu0 %v1095_v2  ;;  %1010 = vmatpush3.bf16.msra.mxu1 %v1095_v2  ;;  %p1185_p5 = pnand %p1184_p0, %p1178_p8 }
  0x65   : > { %958 = vmatprep.subr.bf16.mxu0 %v1096_v3  ;;  %1003 = vmatprep.subr.bf16.mxu1 %v1096_v3 }
  0x68   : > { %959 = vmatpush3.bf16.msra.mxu0 %v1096_v3  ;;  %1011 = vmatpush3.bf16.msra.mxu1 %v1096_v3 }
  0x69   : > { %960 = vmatprep.subr.bf16.mxu0 %v1097_v6  ;;  %1004 = vmatprep.subr.bf16.mxu1 %v1097_v6 }
  0x6c   : > { %961 = vmatpush3.bf16.msra.mxu0 %v1097_v6  ;;  %1012 = vmatpush3.bf16.msra.mxu1 %v1097_v6 }
  0x6d   : > { %962 = vmatprep.subr.bf16.mxu0 %v1098_v7  ;;  %1005 = vmatprep.subr.bf16.mxu1 %v1098_v7 }
  0x70   : > { %963 = vmatpush3.bf16.msra.mxu0 %v1098_v7  ;;  %1013 = vmatpush3.bf16.msra.mxu1 %v1098_v7 }
  0x71   : > { %964 = vmatprep.subr.bf16.mxu0 %v1099_v8  ;;  %1006 = vmatprep.subr.bf16.mxu1 %v1099_v8 }
  0x74   : > { %965 = vmatpush3.bf16.msra.mxu0 %v1099_v8  ;;  %1014 = vmatpush3.bf16.msra.mxu1 %v1099_v8 }
  0x75   : > { %966 = vmatprep.subr.bf16.mxu0 %v1100_v9  ;;  %1007 = vmatprep.subr.bf16.mxu1 %v1100_v9 }
  0x78   : > { %967 = vmatpush3.bf16.msra.mxu0 %v1100_v9  ;;  %1015 = vmatpush3.bf16.msra.mxu1 %v1100_v9 }
  0x7b   : > { %969 = vmatmul.mubr.bf16.vlgmr.msra.gmra.mrb[0].mxu0 %v1103_v10  ;;  %985 = vmatmul.mubr.bf16.vlgmr.msra.gmra.mrb[0].mxu1 %v1104_v11 }
  0x7c   : > { %972 = vmatprep.mubr.bf16.mxu0 %v1105_v12  ;;  %988 = vmatprep.mubr.bf16.mxu1 %v1106_v13 }
  0x83   : > { %973 = vmatmul.mubr.bf16.gmra.mrb[4].mxu0 %v1107_v14  ;;  %989 = vmatmul.mubr.bf16.gmra.mrb[4].mxu1 %v1108_v15 }
  0x84   : > { %976 = vmatprep.mubr.bf16.mxu0 %v1109_v16  ;;  %992 = vmatprep.mubr.bf16.mxu1 %v1110_v17 }
  0x8b   : > { %977 = vmatmul.mubr.bf16.gmra.mrb[8].mxu0 %v1111_v18  ;;  %993 = vmatmul.mubr.bf16.gmra.mrb[8].mxu1 %v1112_v19 }
  0x8c   : > { %980 = vmatprep.mubr.bf16.mxu0 %v1113_v20  ;;  %996 = vmatprep.mubr.bf16.mxu1 %v1114_v21 }
  0x93   : > { %981 = vmatmul.mubr.bf16.gmra.mrb[12].mxu0 %v1115_v22  ;;  %997 = vmatmul.mubr.bf16.gmra.mrb[12].mxu1 %v1116_v23 }
 0x14e   : > { %v970_v24 = vpop.f32.mrb[0].mxu0  ;;  %v986_v25 = vpop.f32.mrb[0].mxu1 }
 0x14f   : > { %738 = vst [vmem:[%s1474_s19 + $0x10] sm:$0xff] %v970_v24  ;;  %754 = vst [vmem:[%s1474_s19 + $0x90] sm:$0xff] %v986_v25  ;;  %v510_v26 = vpop.f32.mrb[1].mxu0  ;;  %v574_v27 = vpop.f32.mrb[1].mxu1 }
 0x150   : > { %736 = vst [vmem:[%s1474_s19] sm:$0xff] %v510_v26  ;;  %752 = vst [vmem:[%s1474_s19 + $0x80] sm:$0xff] %v574_v27  ;;  %v971_v28 = vpop.f32.mrb[2].mxu0  ;;  %v987_v29 = vpop.f32.mrb[2].mxu1 }
 0x151   : > { %739 = vst [vmem:[%s1474_s19 + $0x18] sm:$0xff] %v971_v28  ;;  %755 = vst [vmem:[%s1474_s19 + $0x98] sm:$0xff] %v987_v29  ;;  %v513_v30 = vpop.f32.mrb[3].mxu0  ;;  %v577_v31 = vpop.f32.mrb[3].mxu1 }
 0x152   : > { %737 = vst [vmem:[%s1474_s19 + $0x8] sm:$0xff] %v513_v30  ;;  %753 = vst [vmem:[%s1474_s19 + $0x88] sm:$0xff] %v577_v31 }
 0x156   : > { %v974_v32 = vpop.f32.mrb[4].mxu0  ;;  %v990_v33 = vpop.f32.mrb[4].mxu1 }
 0x157   : > { %742 = vst [vmem:[%s1474_s19 + $0x30] sm:$0xff] %v974_v32  ;;  %758 = vst [vmem:[%s1474_s19 + $0xb0] sm:$0xff] %v990_v33  ;;  %v526_v34 = vpop.f32.mrb[5].mxu0  ;;  %v590_v35 = vpop.f32.mrb[5].mxu1 }
 0x158   : > { %740 = vst [vmem:[%s1474_s19 + $0x20] sm:$0xff] %v526_v34  ;;  %756 = vst [vmem:[%s1474_s19 + $0xa0] sm:$0xff] %v590_v35  ;;  %v975_v36 = vpop.f32.mrb[6].mxu0  ;;  %v991_v37 = vpop.f32.mrb[6].mxu1 }
 0x159   : > { %743 = vst [vmem:[%s1474_s19 + $0x38] sm:$0xff] %v975_v36  ;;  %759 = vst [vmem:[%s1474_s19 + $0xb8] sm:$0xff] %v991_v37  ;;  %v529_v38 = vpop.f32.mrb[7].mxu0  ;;  %v593_v39 = vpop.f32.mrb[7].mxu1 }
 0x15a   : > { %741 = vst [vmem:[%s1474_s19 + $0x28] sm:$0xff] %v529_v38  ;;  %757 = vst [vmem:[%s1474_s19 + $0xa8] sm:$0xff] %v593_v39 }
 0x15e   : > { %v978_v40 = vpop.f32.mrb[8].mxu0  ;;  %v994_v41 = vpop.f32.mrb[8].mxu1 }
 0x15f   : > { %746 = vst [vmem:[%s1474_s19 + $0x50] sm:$0xff] %v978_v40  ;;  %762 = vst [vmem:[%s1474_s19 + $0xd0] sm:$0xff] %v994_v41  ;;  %v542_v42 = vpop.f32.mrb[9].mxu0  ;;  %v606_v43 = vpop.f32.mrb[9].mxu1 }
 0x160   : > { %744 = vst [vmem:[%s1474_s19 + $0x40] sm:$0xff] %v542_v42  ;;  %760 = vst [vmem:[%s1474_s19 + $0xc0] sm:$0xff] %v606_v43  ;;  %v979_v44 = vpop.f32.mrb[10].mxu0  ;;  %v995_v45 = vpop.f32.mrb[10].mxu1 }
 0x161   : > { %747 = vst [vmem:[%s1474_s19 + $0x58] sm:$0xff] %v979_v44  ;;  %763 = vst [vmem:[%s1474_s19 + $0xd8] sm:$0xff] %v995_v45  ;;  %v545_v46 = vpop.f32.mrb[11].mxu0  ;;  %v609_v47 = vpop.f32.mrb[11].mxu1 }
 0x162   : > { %745 = vst [vmem:[%s1474_s19 + $0x48] sm:$0xff] %v545_v46  ;;  %761 = vst [vmem:[%s1474_s19 + $0xc8] sm:$0xff] %v609_v47 }
 0x166   : > { %v982_v48 = vpop.f32.mrb[12].mxu0  ;;  %v998_v49 = vpop.f32.mrb[12].mxu1 }
 0x167   : > { %750 = vst [vmem:[%s1474_s19 + $0x70] sm:$0xff] %v982_v48  ;;  %766 = vst [vmem:[%s1474_s19 + $0xf0] sm:$0xff] %v998_v49  ;;  %v558_v50 = vpop.f32.mrb[13].mxu0  ;;  %v622_v51 = vpop.f32.mrb[13].mxu1 }
 0x168   : > { %748 = vst [vmem:[%s1474_s19 + $0x60] sm:$0xff] %v558_v50  ;;  %764 = vst [vmem:[%s1474_s19 + $0xe0] sm:$0xff] %v622_v51  ;;  %v983_v52 = vpop.f32.mrb[14].mxu0  ;;  %v999_v53 = vpop.f32.mrb[14].mxu1 }
 0x169   : > { %751 = vst [vmem:[%s1474_s19 + $0x78] sm:$0xff] %v983_v52  ;;  %767 = vst [vmem:[%s1474_s19 + $0xf8] sm:$0xff] %v999_v53  ;;  %v561_v54 = vpop.f32.mrb[15].mxu0  ;;  %v625_v55 = vpop.f32.mrb[15].mxu1 }
 0x16a   : > { %749 = vst [vmem:[%s1474_s19 + $0x68] sm:$0xff] %v561_v54  ;;  %765 = vst [vmem:[%s1474_s19 + $0xe8] sm:$0xff] %v625_v55 }
 0x16b   : > { %1188 = shalt.err (!%p1185_p5)
}
 0x16c   : > { %s1189_s3 = scalar_lea.hbm %s1507_s5, 4096  ;;  %s1193_s27 = scalar_lea.hbm %s1566_s2, 8192 }
 0x16d   : > { %p1190_p9 = scmp.ne.s32.totalorder %s1507_s5, %s1189_s3  ;;  %p1194_p3 = scmp.lt.u32.totalorder %s1507_s5, %s1566_s2 }
 0x16e   : > { %p1195_p7 = scmp.lt.u32.totalorder %s1193_s27, %s1189_s3  ;;  %p1197_p4 = scmp.lt.u32.totalorder %s1189_s3, %s1507_s5 }
 0x16f   : > { %p1191_p1 = pnand %p1190_p9, %p1384_p10 }
 0x170   : > { %p1196_p13 = por %p1195_p7, %p1194_p3 }
 0x171   : > { %p1192_p2 = pneg %p1191_p1 }
 0x172   : > { %p1198_p6 = por %p1197_p4, %p1196_p13 }
 0x174   : > { %p1199_p8 = pnand %p1198_p6, %p1192_p2 }
 0x176   : > { %1202 = shalt.err (!%p1199_p8)
}
 0x177   : > { %s1268_s17 = smov 128   ;;  %s1269_s19 = smov 8  }
 0x178   : > { %1022 = dma.vmem_to_hbm [thread:$0]  (%p1384_p10), %s1509_s6, 4096, %s1507_s5, %s769_s12, %s1268_s17, %s1268_s17, %s1269_s19  }
 0x179 PF: > { %s798_s21 = sand.u32 1, %s1241_s9   ;;  %p1584_p12 = scmp.ne.s32.totalorder %s1574_s20, 0 }
 0x17a   : > { %p1585_p11 = scmp.ge.s32.totalorder %s1261_s14, 2  ;;  %s799_s7 = scalar_lea.sflag [#allocation5], %s798_s21 }
 0x17c   : > { %p1033_p0 = pnand %p1585_p11, %p1584_p12 }
 0x17e   : > { %1236 = dma.done.wait (!%p1033_p0), %s799_s7, 4096  }
 0x17f   : > { %1238 = vsyncadd (!%p1033_p0), %s799_s7, 4294963200  ;;  %s19_s14 = sadd.s32 1, %s1261_s14   ;;  %s1586_s9 = smov %s1245_s10 }
 0x180   : > { %p16_p5 = scmp.ge.s32.totalorder %s19_s14, 4   ;;  %s1587_s10 = smov %s1249_s11 }
 0x181   : > { %s1588_s11 = smov %s1393_s28  ;;  %s1589_s12 = smov %s1257_s13 }
 0x182   : > { %s1590_s13 = smov %s1592_s25  ;;  %18 = sbr.rel (!%p16_p5) target bundleno = 7 (0x7), region = 86 }
 0x189   :  { %804 = vsyncpa [#allocation4], 1 }
 0x18a   :  { %806 = vsyncpa [#allocation4 + $0x1], 1 }
 0x18b   :  { %807 = vsyncpa [#allocation7], 1 }
 0x18c   :  { %808 = vsyncpa [#allocation5], 1 }
 0x18d   :  { %810 = vsyncpa [#allocation5 + $0x1], 1 }

</bundles_post_ra>
